<compile_context>
chip_gen: v5e
topology: v5e:2x2
jax: 0.10.0
libtpu: 0.0.40
codegen_flags: <defaults>
</compile_context>

<pallas_src>
import jax
import jax.numpy as jnp
from jax.experimental import pallas as pl
from jax.experimental.pallas import tpu as pltpu


def mlp_kernel(xT_ref,
               w1_ref, b1_ref,
               w2_ref, b2_ref,
               w3_ref, b3_ref,
               w4_ref, b4_ref,
               oT_ref):
    # Batch-on-lanes layout: activations are (features, TILE_B).
    x = xT_ref[...]                                         # (8, TB)

    # Layer 1: Linear(8, 8) + ReLU   (Dropout = identity at inference)
    h = jnp.dot(w1_ref[...], x, preferred_element_type=jnp.float32)
    h = jnp.maximum(h + b1_ref[...], 0.0)                   # (8, TB)

    # Layer 2: Linear(8, 128) + ReLU
    h = jnp.dot(w2_ref[...], h, preferred_element_type=jnp.float32)
    h = jnp.maximum(h + b2_ref[...], 0.0)                   # (128, TB)

    # Layer 3: Linear(128, 32) + ReLU
    h = jnp.dot(w3_ref[...], h, preferred_element_type=jnp.float32)
    h = jnp.maximum(h + b3_ref[...], 0.0)                   # (32, TB)

    # Layer 4: Linear(32, 8) + LeakyReLU (negative_slope = 0.01, PyTorch default)
    h = jnp.dot(w4_ref[...], h, preferred_element_type=jnp.float32)
    h = h + b4_ref[...]                                     # (8, TB)
    oT_ref[...] = jnp.where(h > 0, h, 0.01 * h)


def nn_final_forward(x, params, *, tile_b=512):
    """x: (B, 8) float32.  params: PyTorch-native (out, in) weights, (out, 1) biases.

    Returns (B, 8) float32.  Wrapper-side transposes present a lane-dense
    (features, batch) slab to the kernel; this is layout plumbing only.
    """
    B = x.shape[0]
    xT = x.T.astype(jnp.float32)                            # (8, B) batch on lanes

    if B <= tile_b:
        tb = B                                              # single full-dim block
    else:
        assert tile_b % 128 == 0, "tile_b must be a multiple of 128"
        tb = tile_b
    grid = (pl.cdiv(B, tb),)

    x_spec = pl.BlockSpec((8, tb), lambda i: (0, i))
    o_spec = pl.BlockSpec((8, tb), lambda i: (0, i))

    def resident(shape):
        # Full-array block, constant index_map -> DMA'd once, stays in VMEM.
        return pl.BlockSpec(shape, lambda i: (0, 0))

    args = (xT,
            params["w1"], params["b1"],
            params["w2"], params["b2"],
            params["w3"], params["b3"],
            params["w4"], params["b4"])
    in_specs = [x_spec] + [resident(a.shape) for a in args[1:]]

    yT = pl.pallas_call(
        mlp_kernel,
        grid=grid,
        out_shape=jax.ShapeDtypeStruct((8, B), jnp.float32),
        in_specs=in_specs,
        out_specs=o_spec,
        compiler_params=pltpu.CompilerParams(
            dimension_semantics=("parallel",)),
    )(*args)
    return yT.T                                             # (B, 8)


def init_params(key):
    """Deterministic init mimicking PyTorch Linear defaults (uniform +-1/sqrt(fan_in)).
    Weights stored PyTorch-native as (out, in); biases as (out, 1) columns."""
    dims = [(8, 8), (8, 128), (128, 32), (32, 8)]           # (fan_in, fan_out)
    params = {}
    keys = jax.random.split(key, 2 * len(dims))
    for i, (fin, fout) in enumerate(dims):
        bound = 1.0 / jnp.sqrt(float(fin))
        w = jax.random.uniform(keys[2 * i], (fout, fin),
                               minval=-bound, maxval=bound, dtype=jnp.float32)
        b = jax.random.uniform(keys[2 * i + 1], (fout, 1),
                               minval=-bound, maxval=bound, dtype=jnp.float32)
        params[f"w{i + 1}"] = w
        params[f"b{i + 1}"] = b
    return params


if __name__ == "__main__":
    key = jax.random.PRNGKey(0)
    pkey, xkey = jax.random.split(key)
    params = init_params(pkey)

    # conc_demand: batch of 512 samples, 8 features each.
    # tile_b=128 exercises the batch grid (4 steps, double-buffered, parallel).
    B = 512
    x = jax.random.normal(xkey, (B, 8), dtype=jnp.float32)

    out = nn_final_forward(x, params, tile_b=128)
    jax.block_until_ready(out)

    # Pure-JAX reference (row-major, PyTorch semantics) for a sanity check.
    def ref(xx, p):
        h = jnp.maximum(xx @ p["w1"].T + p["b1"].T, 0.0)
        h = jnp.maximum(h @ p["w2"].T + p["b2"].T, 0.0)
        h = jnp.maximum(h @ p["w3"].T + p["b3"].T, 0.0)
        h = h @ p["w4"].T + p["b4"].T
        return jnp.where(h > 0, h, 0.01 * h)

    ref_out = ref(x, params)
    assert out.shape == (B, 8)
    assert jnp.allclose(out, ref_out, atol=1e-4, rtol=1e-4), (
        float(jnp.max(jnp.abs(out - ref_out))))
    print("KERNEL_OK")
</pallas_src>

<mosaic_0001>
module attributes {stable_mosaic.version = 11 : i64} {
  func.func @mlp_kernel(%arg0: i32, %arg1: memref<8x128xf32, #tpu.memory_space<vmem>>, %arg2: memref<8x8xf32, #tpu.memory_space<vmem>>, %arg3: memref<8x1xf32, #tpu.memory_space<vmem>>, %arg4: memref<128x8xf32, #tpu.memory_space<vmem>>, %arg5: memref<128x1xf32, #tpu.memory_space<vmem>>, %arg6: memref<32x128xf32, #tpu.memory_space<vmem>>, %arg7: memref<32x1xf32, #tpu.memory_space<vmem>>, %arg8: memref<8x32xf32, #tpu.memory_space<vmem>>, %arg9: memref<8x1xf32, #tpu.memory_space<vmem>>, %arg10: memref<8x128xf32, #tpu.memory_space<vmem>>) attributes {dimension_semantics = [#tpu.dimension_semantics<parallel>], iteration_bounds = array<i64: 4>, scalar_prefetch = 0 : i64, scratch_operands = 0 : i64, tpu.core_type = #tpu.core_type<tc>, window_params = [{transform_indices = @transform_0, window_bounds = array<i64: 8, 128>}, {pipeline_mode = #tpu.pipeline_mode<synchronous>, transform_indices = @transform_1, window_bounds = array<i64: 8, 8>}, {pipeline_mode = #tpu.pipeline_mode<synchronous>, transform_indices = @transform_2, window_bounds = array<i64: 8, 1>}, {pipeline_mode = #tpu.pipeline_mode<synchronous>, transform_indices = @transform_3, window_bounds = array<i64: 128, 8>}, {pipeline_mode = #tpu.pipeline_mode<synchronous>, transform_indices = @transform_4, window_bounds = array<i64: 128, 1>}, {pipeline_mode = #tpu.pipeline_mode<synchronous>, transform_indices = @transform_5, window_bounds = array<i64: 32, 128>}, {pipeline_mode = #tpu.pipeline_mode<synchronous>, transform_indices = @transform_6, window_bounds = array<i64: 32, 1>}, {pipeline_mode = #tpu.pipeline_mode<synchronous>, transform_indices = @transform_7, window_bounds = array<i64: 8, 32>}, {pipeline_mode = #tpu.pipeline_mode<synchronous>, transform_indices = @transform_8, window_bounds = array<i64: 8, 1>}, {transform_indices = @transform_9, window_bounds = array<i64: 8, 128>}]} {
    %c0 = arith.constant 0 : index
    %c0_0 = arith.constant 0 : index
    %0 = vector.load %arg1[%c0, %c0_0] : memref<8x128xf32, #tpu.memory_space<vmem>>, vector<8x128xf32>
    %c0_1 = arith.constant 0 : index
    %c0_2 = arith.constant 0 : index
    %1 = vector.load %arg2[%c0_1, %c0_2] : memref<8x8xf32, #tpu.memory_space<vmem>>, vector<8x8xf32>
    %cst = arith.constant dense<0.000000e+00> : vector<8x128xf32>
    %2 = tpu.matmul %1, %0, %cst {dimension_numbers = #tpu.dot_dimension_numbers<[1], [0], [0], [1], [0, 0, 1, 1], [], []>} : vector<8x8xf32>, vector<8x128xf32>, vector<8x128xf32> -> vector<8x128xf32>
    %c0_3 = arith.constant 0 : index
    %c0_4 = arith.constant 0 : index
    %3 = vector.load %arg3[%c0_3, %c0_4] : memref<8x1xf32, #tpu.memory_space<vmem>>, vector<8x1xf32>
    %4 = vector.broadcast %3 : vector<8x1xf32> to vector<8x128xf32>
    %5 = arith.addf %2, %4 : vector<8x128xf32>
    %cst_5 = arith.constant 0.000000e+00 : f32
    %6 = vector.broadcast %cst_5 : f32 to vector<8x128xf32>
    %7 = arith.maximumf %5, %6 : vector<8x128xf32>
    %c0_6 = arith.constant 0 : index
    %c0_7 = arith.constant 0 : index
    %8 = vector.load %arg4[%c0_6, %c0_7] : memref<128x8xf32, #tpu.memory_space<vmem>>, vector<128x8xf32>
    %cst_8 = arith.constant dense<0.000000e+00> : vector<128x128xf32>
    %9 = tpu.matmul %8, %7, %cst_8 {dimension_numbers = #tpu.dot_dimension_numbers<[1], [0], [0], [1], [0, 0, 1, 1], [], []>} : vector<128x8xf32>, vector<8x128xf32>, vector<128x128xf32> -> vector<128x128xf32>
    %c0_9 = arith.constant 0 : index
    %c0_10 = arith.constant 0 : index
    %10 = vector.load %arg5[%c0_9, %c0_10] : memref<128x1xf32, #tpu.memory_space<vmem>>, vector<128x1xf32>
    %11 = vector.broadcast %10 : vector<128x1xf32> to vector<128x128xf32>
    %12 = arith.addf %9, %11 : vector<128x128xf32>
    %cst_11 = arith.constant 0.000000e+00 : f32
    %13 = vector.broadcast %cst_11 : f32 to vector<128x128xf32>
    %14 = arith.maximumf %12, %13 : vector<128x128xf32>
    %c0_12 = arith.constant 0 : index
    %c0_13 = arith.constant 0 : index
    %15 = vector.load %arg6[%c0_12, %c0_13] : memref<32x128xf32, #tpu.memory_space<vmem>>, vector<32x128xf32>
    %cst_14 = arith.constant dense<0.000000e+00> : vector<32x128xf32>
    %16 = tpu.matmul %15, %14, %cst_14 {dimension_numbers = #tpu.dot_dimension_numbers<[1], [0], [0], [1], [0, 0, 1, 1], [], []>} : vector<32x128xf32>, vector<128x128xf32>, vector<32x128xf32> -> vector<32x128xf32>
    %c0_15 = arith.constant 0 : index
    %c0_16 = arith.constant 0 : index
    %17 = vector.load %arg7[%c0_15, %c0_16] : memref<32x1xf32, #tpu.memory_space<vmem>>, vector<32x1xf32>
    %18 = vector.broadcast %17 : vector<32x1xf32> to vector<32x128xf32>
    %19 = arith.addf %16, %18 : vector<32x128xf32>
    %cst_17 = arith.constant 0.000000e+00 : f32
    %20 = vector.broadcast %cst_17 : f32 to vector<32x128xf32>
    %21 = arith.maximumf %19, %20 : vector<32x128xf32>
    %c0_18 = arith.constant 0 : index
    %c0_19 = arith.constant 0 : index
    %22 = vector.load %arg8[%c0_18, %c0_19] : memref<8x32xf32, #tpu.memory_space<vmem>>, vector<8x32xf32>
    %cst_20 = arith.constant dense<0.000000e+00> : vector<8x128xf32>
    %23 = tpu.matmul %22, %21, %cst_20 {dimension_numbers = #tpu.dot_dimension_numbers<[1], [0], [0], [1], [0, 0, 1, 1], [], []>} : vector<8x32xf32>, vector<32x128xf32>, vector<8x128xf32> -> vector<8x128xf32>
    %c0_21 = arith.constant 0 : index
    %c0_22 = arith.constant 0 : index
    %24 = vector.load %arg9[%c0_21, %c0_22] : memref<8x1xf32, #tpu.memory_space<vmem>>, vector<8x1xf32>
    %25 = vector.broadcast %24 : vector<8x1xf32> to vector<8x128xf32>
    %26 = arith.addf %23, %25 : vector<8x128xf32>
    %cst_23 = arith.constant 0.000000e+00 : f32
    %27 = vector.broadcast %cst_23 : f32 to vector<8x128xf32>
    %28 = arith.cmpf ogt, %26, %27 : vector<8x128xf32>
    %cst_24 = arith.constant 0.00999999977 : f32
    %29 = vector.broadcast %cst_24 : f32 to vector<8x128xf32>
    %30 = arith.mulf %29, %26 : vector<8x128xf32>
    %31 = arith.select %28, %26, %30 : vector<8x128xi1>, vector<8x128xf32>
    %c0_25 = arith.constant 0 : index
    %c0_26 = arith.constant 0 : index
    %32 = vector.load %arg10[%c0_25, %c0_26] : memref<8x128xf32, #tpu.memory_space<vmem>>, vector<8x128xf32>
    tpu.vector_store %arg10[%c0_25, %c0_26], %31 {strides = array<i32>} : memref<8x128xf32, #tpu.memory_space<vmem>>, vector<8x128xf32>,
    return
  }
  func.func @transform_0(%arg0: i32) -> (i32, i32) {
    %c0_i32 = arith.constant 0 : i32
    %c0_i32_0 = arith.constant 0 : i32
    return %c0_i32, %arg0 : i32, i32
  }
  func.func @transform_1(%arg0: i32) -> (i32, i32) {
    %c0_i32 = arith.constant 0 : i32
    %c0_i32_0 = arith.constant 0 : i32
    %c0_i32_1 = arith.constant 0 : i32
    return %c0_i32, %c0_i32_0 : i32, i32
  }
  func.func @transform_2(%arg0: i32) -> (i32, i32) {
    %c0_i32 = arith.constant 0 : i32
    %c0_i32_0 = arith.constant 0 : i32
    %c0_i32_1 = arith.constant 0 : i32
    return %c0_i32, %c0_i32_0 : i32, i32
  }
  func.func @transform_3(%arg0: i32) -> (i32, i32) {
    %c0_i32 = arith.constant 0 : i32
    %c0_i32_0 = arith.constant 0 : i32
    %c0_i32_1 = arith.constant 0 : i32
    return %c0_i32, %c0_i32_0 : i32, i32
  }
  func.func @transform_4(%arg0: i32) -> (i32, i32) {
    %c0_i32 = arith.constant 0 : i32
    %c0_i32_0 = arith.constant 0 : i32
    %c0_i32_1 = arith.constant 0 : i32
    return %c0_i32, %c0_i32_0 : i32, i32
  }
  func.func @transform_5(%arg0: i32) -> (i32, i32) {
    %c0_i32 = arith.constant 0 : i32
    %c0_i32_0 = arith.constant 0 : i32
    %c0_i32_1 = arith.constant 0 : i32
    return %c0_i32, %c0_i32_0 : i32, i32
  }
  func.func @transform_6(%arg0: i32) -> (i32, i32) {
    %c0_i32 = arith.constant 0 : i32
    %c0_i32_0 = arith.constant 0 : i32
    %c0_i32_1 = arith.constant 0 : i32
    return %c0_i32, %c0_i32_0 : i32, i32
  }
  func.func @transform_7(%arg0: i32) -> (i32, i32) {
    %c0_i32 = arith.constant 0 : i32
    %c0_i32_0 = arith.constant 0 : i32
    %c0_i32_1 = arith.constant 0 : i32
    return %c0_i32, %c0_i32_0 : i32, i32
  }
  func.func @transform_8(%arg0: i32) -> (i32, i32) {
    %c0_i32 = arith.constant 0 : i32
    %c0_i32_0 = arith.constant 0 : i32
    %c0_i32_1 = arith.constant 0 : i32
    return %c0_i32, %c0_i32_0 : i32, i32
  }
  func.func @transform_9(%arg0: i32) -> (i32, i32) {
    %c0_i32 = arith.constant 0 : i32
    %c0_i32_0 = arith.constant 0 : i32
    return %c0_i32, %arg0 : i32, i32
  }
}

</mosaic_0001>

<bundles_post_ra>
// kernel: tpu_custom_call.1
= control target key start
LH: loop header
LB: loop body
LE: loop exit
PB: predicated region body
PF: predicated region fallthrough
CT: control target
= control target key end

     0   :  { %14 = vsyncpa [#allocation3], 0  ;;  %s1217_s0 = inlined_call_operand.vmem [shape: f32[8,512], index: 0, kind: input, shape index: {}]   ;;  %s1218_s1 = inlined_call_operand.vmem [shape: f32[8,8], index: 1, kind: input, shape index: {}]   ;;  %s1219_s2 = inlined_call_operand.vmem [shape: f32[8,1], index: 2, kind: input, shape index: {}]   ;;  %s1220_s3 = inlined_call_operand.vmem [shape: f32[128,8], index: 3, kind: input, shape index: {}]   ;;  %s1221_s4 = inlined_call_operand.vmem [shape: f32[128,1], index: 4, kind: input, shape index: {}]   ;;  %s1222_s5 = inlined_call_operand.vmem [shape: f32[32,128], index: 5, kind: input, shape index: {}]   ;;  %s1223_s6 = inlined_call_operand.vmem [shape: f32[32,1], index: 6, kind: input, shape index: {}]   ;;  %s1224_s7 = inlined_call_operand.vmem [shape: f32[8,32], index: 7, kind: input, shape index: {}]   ;;  %s1225_s8 = inlined_call_operand.vmem [shape: f32[8,1], index: 8, kind: input, shape index: {}]   ;;  %s1226_s9 = inlined_call_operand.hbm [shape: f32[8,512], index: 9, kind: output, shape index: {}]  }
   0x1   :  { %16 = vsyncpa [#allocation3 + $0x1], 0  ;;  %s977_s30 = smov 0   ;;  %s979_s10 = smov 0  }
   0x2   :  { %s981_s11 = smov 0   ;;  %s983_s12 = smov 0  }
   0x3 LB: > { %s998_s13 = sadd.s32 4294967295, %s924_s12   ;;  %s773_s14 = sadd.s32 4294967294, %s924_s12   ;;  %s924_s12 = sphi %s983_s12, %s1232_s12   ;;  %s920_s11 = sphi %s981_s11, %s1231_s11   ;;  %s916_s10 = sphi %s979_s10, %s1230_s10   ;;  %s912_s30 = sphi %s977_s30, %s1229_s30  }
   0x4   : > { %s1002_s15 = sadd.s32 1, %s924_s12   ;;  %s223_s16 = sadd.s32 1, %s920_s11 }
   0x5   : > { %s220_s17 = ssub.s32 %s924_s12, %s1002_s15  ;;  %p233_p0 = scmp.ne.s32.totalorder %s920_s11, %s916_s10 }
   0x6   : > { %p221_p1 = scmp.eq.s32.totalorder %s220_s17, 0  ;;  %p234_p2 = scmp.eq.s32.totalorder %s998_s13, 3 }
   0x7   : > { %p239_p3 = scmp.ne.s32.totalorder %s916_s10, %s912_s30  ;;  %p240_p4 = scmp.eq.s32.totalorder %s773_s14, 3 }
   0x8   : > { %s1013_s18 = scalar_select %p221_p1, %s920_s11, %s223_s16  }
   0x9   : > { %p1015_p5 = por %p234_p2, %p233_p0  ;;  %p1019_p6 = por %p240_p4, %p239_p3 }
   0xa   : > { %p776_p7 = scmp.ge.s32.totalorder %s924_s12, 1  ;;  %p289_p8 = scmp.lt.s32.totalorder %s924_s12, 5 }
   0xc   : > { %p290_p9 = pnand %p776_p7, %p289_p8 }
   0xd   : > { %p324_p10 = scmp.lt.s32.totalorder (!%p290_p9), %s998_s13, 3  ;;  %s321_s14 = sand.u32 (!%p290_p9), 1, %s916_s10  }
   0xe   : > { %293 = sbr.rel (%p290_p9) target bundleno = 657 (0x291), region = 56  ;;  %s777_s16 = sshll.u32 (!%p290_p9), %s321_s14, 3 }
   0xf   : > { %s798_s17 = sshll.u32 (!%p290_p9), %s998_s13, 3 }
  0x13   : > { %v330_v0 = vld [vmem:[%s1219_s2] sm:$0xff]  ;;  %v926_v1 = vmov 0   ;;  %s325_s23 = scalar_select %p324_p10, %s998_s13, 3  ;;  %vm336_vm0 = vcmask 64512   ;;  %v392_v4 = vld [vmem:[%s1221_s4 + $0x78] sm:$0xff]  ;;  %v387_v5 = vld [vmem:[%s1221_s4 + $0x50] sm:$0xff] }
  0x14   : > { %859 = vset.pattern.permute.xlu0 %v926_v1  ;;  %860 = vset.pattern.permute.xlu1 %v926_v1  ;;  %v329_v2 = vld [vmem:[%s1218_s1] sm:$0xff]  ;;  %v384_v6 = vld [vmem:[%s1221_s4 + $0x38] sm:$0xff]  ;;  %v378_v8 = vld [vmem:[%s1221_s4 + $0x8] sm:$0xff]  ;;  %vm670_vm1 = vcmask 261120  }
  0x15   : > { %333 = vperm.xlu0 %859, %v330_v0   ;;  %861 = vset.pattern.permute.xlu2 %v926_v1  ;;  %s778_s24 = sshll.u32 %s325_s23, 3  ;;  %v381_v7 = vld [vmem:[%s1221_s4 + $0x20] sm:$0xff]  ;;  %v608_v9 = vld [vmem:[%s1223_s6 + $0x10] sm:$0xff]  ;;  %v390_v12 = vld [vmem:[%s1221_s4 + $0x68] sm:$0xff]  ;;  %s709_s23 = scalar_lea.hbm %s1226_s9, %s798_s17 }
  0x16   : > { %s327_s27 = scalar_lea.vmem %s1217_s0, %s778_s24  ;;  %v664_v10 = vld [vmem:[%s1225_s8] sm:$0xff]  ;;  %v391_v11 = vld [vmem:[%s1221_s4 + $0x70] sm:$0xff]  ;;  %v386_v13 = vld [vmem:[%s1221_s4 + $0x48] sm:$0xff]  ;;  %s323_s24 = scalar_lea.vmem [#allocation2], %s777_s16 }
  0x17   : > { %v328_v3 = vld [vmem:[%s327_s27] sm:$0xff]  ;;  %465 = vperm.xlu1 %860, %v391_v11   ;;  %v383_v14 = vld [vmem:[%s1221_s4 + $0x30] sm:$0xff]  ;;  %v380_v16 = vld [vmem:[%s1221_s4 + $0x18] sm:$0xff]  ;;  %s711_s25 = sshll.u32 %s323_s24, 4  ;;  %s713_s26 = sshll.u32 %s709_s23, 4  ;;  %s712_s25 = int_to_ptr.vmem [resolvable:$true] %s711_s25  ;;  %s714_s26 = int_to_ptr.hbm [resolvable:$true] %s713_s26 }
  0x18   : > { %355 = vmatpush.msra.mxu0 %v328_v3  ;;  %v389_v15 = vld [vmem:[%s1221_s4 + $0x60] sm:$0xff]  ;;  %v388_v17 = vld [vmem:[%s1221_s4 + $0x58] sm:$0xff]  ;;  %v367_v23 = vld [vmem:[%s1220_s3 + $0x30] sm:$0xff]  ;;  %s699_s27 = scalar_lea.sflag [#allocation3], %s321_s14  ;;  %s876_s28 = sshra.s32 %s714_s26, 4  ;;  %s877_s28 = int_to_ptr.hbm [resolvable:$true] %s876_s28 }
  0x19   : > { %779 = vmatmul.msk.f32.vlgmr.msra.gmra.mxu0 %vm336_vm0, %v329_v2  ;;  %455 = vperm.xlu2 %861, %v389_v15   ;;  %v361_v22 = vld [vmem:[%s1220_s3] sm:$0xff]  ;;  %v374_v24 = vld [vmem:[%s1220_s3 + $0x68] sm:$0xff]  ;;  %v368_v28 = vld [vmem:[%s1220_s3 + $0x38] sm:$0xff]  ;;  %s878_s13 = scalar_lea.hbm %s877_s28, 8  ;;  %s882_s16 = scalar_lea.hbm %s1226_s9, 32 }
  0x1a   : > { %v377_v25 = vld [vmem:[%s1221_s4] sm:$0xff]  ;;  %v362_v27 = vld [vmem:[%s1220_s3 + $0x8] sm:$0xff]  ;;  %v375_v29 = vld [vmem:[%s1220_s3 + $0x70] sm:$0xff]  ;;  %p879_p11 = scmp.ne.s32.totalorder %s877_s28, %s878_s13  ;;  %p883_p0 = scmp.lt.s32.totalorder %s877_s28, %s1226_s9 }
  0x1b   : > { %v385_v26 = vld [vmem:[%s1221_s4 + $0x40] sm:$0xff]  ;;  %v607_v30 = vld [vmem:[%s1223_s6 + $0x8] sm:$0xff]  ;;  %v363_v32 = vld [vmem:[%s1220_s3 + $0x10] sm:$0xff]  ;;  %p884_p1 = scmp.lt.s32.totalorder %s882_s16, %s878_s13 }
  0x1c   : > { %v382_v31 = vld [vmem:[%s1221_s4 + $0x28] sm:$0xff]  ;;  %v369_v33 = vld [vmem:[%s1220_s3 + $0x40] sm:$0xff]  ;;  %v376_v34 = vld [vmem:[%s1220_s3 + $0x78] sm:$0xff]  ;;  %p880_p12 = pnand %p879_p11, %p1015_p5 }
  0x1d   : > { %470 = vperm.xlu0 %859, %v392_v4   ;;  %v379_v35 = vld [vmem:[%s1221_s4 + $0x10] sm:$0xff]  ;;  %v364_v36 = vld [vmem:[%s1220_s3 + $0x18] sm:$0xff]  ;;  %v370_v37 = vld [vmem:[%s1220_s3 + $0x48] sm:$0xff]  ;;  %p885_p2 = por %p884_p1, %p883_p0 }
  0x1e   : > { %v609_v38 = vld [vmem:[%s1223_s6 + $0x18] sm:$0xff]  ;;  %v365_v39 = vld [vmem:[%s1220_s3 + $0x20] sm:$0xff]  ;;  %v371_v40 = vld [vmem:[%s1220_s3 + $0x50] sm:$0xff]  ;;  %p881_p13 = pneg %p880_p12 }
  0x1f   : > { %460 = vperm.xlu1 %860, %v390_v12   ;;  %v606_v41 = vld [vmem:[%s1223_s6] sm:$0xff]  ;;  %v366_v42 = vld [vmem:[%s1220_s3 + $0x28] sm:$0xff]  ;;  %v372_v43 = vld [vmem:[%s1220_s3 + $0x58] sm:$0xff] }
  0x20   : > { %v373_v44 = vld [vmem:[%s1220_s3 + $0x60] sm:$0xff]  ;;  %p886_p3 = pnand %p885_p2, %p881_p13 }
  0x21   : > { %450 = vperm.xlu2 %861, %v388_v17  }
  0x25   : > { %445 = vperm.xlu0 %859, %v387_v5  }
  0x27   : > { %440 = vperm.xlu1 %860, %v386_v13  }
  0x29   : > { %435 = vperm.xlu2 %861, %v385_v26  }
  0x2d   : > { %430 = vperm.xlu0 %859, %v384_v6  }
  0x2f   : > { %425 = vperm.xlu1 %860, %v383_v14  }
  0x31   : > { %420 = vperm.xlu2 %861, %v382_v31  }
  0x35   : > { %415 = vperm.xlu0 %859, %v381_v7  }
  0x37   : > { %410 = vperm.xlu1 %860, %v380_v16  }
  0x39   : > { %405 = vperm.xlu2 %861, %v379_v35  }
  0x3d   : > { %400 = vperm.xlu0 %859, %v378_v8  }
  0x3f   : > { %395 = vperm.xlu1 %860, %v377_v25  }
  0x41   : > { %627 = vperm.xlu2 %861, %v609_v38  }
  0x45   : > { %622 = vperm.xlu0 %859, %v608_v9  }
  0x47   : > { %617 = vperm.xlu1 %860, %v607_v30  }
  0x49   : > { %612 = vperm.xlu2 %861, %v606_v41  }
  0x4d   : > { %667 = vperm.xlu0 %859, %v664_v10  }
  0x73   : > { %v456_v62 = vpop.permute.xlu2 %455 }
  0x7b   : > { %v451_v2 = vpop.permute.xlu2 %450 }
  0x83   : > { %v436_v7 = vpop.permute.xlu2 %435 }
  0x87   : > { %v334_v18 = vpop.permute.xlu0 %333 }
  0x89   : > { %v466_v49 = vpop.permute.xlu1 %465 }
  0x8f   : > { %v471_v53 = vpop.permute.xlu0 %470 }
  0x91   : > { %v461_v55 = vpop.permute.xlu1 %460 }
  0x96   : > { %v357_v19 = vpop.f32.mrf.mxu0 }
  0x97   : > { %v358_v20 = vadd.f32 %v357_v19, %v334_v18  ;;  %v446_v3 = vpop.permute.xlu0 %445 }
  0x99   : > { %v360_v21 = vmax.f32 %v358_v20, 0.0  ;;  %v441_v5 = vpop.permute.xlu1 %440  ;;  %v421_v20 = vpop.permute.xlu2 %420 }
  0x9b   : > { %536 = vmatpush.msrb.mxu0 %v360_v21  ;;  %801 = vmatpush.msra.mxu1 %v360_v21 }
  0x9c   : > { %802 = vmatpush.msra.mxu3 %v360_v21  ;;  %780 = vmatmul.msk.f32.vlgmr.msrb.gmra.mxu0 %vm336_vm0, %v361_v22 }
  0x9d   : > { %786 = vmatmul.msk.f32.vlgmr.msra.gmra.mxu1 %vm336_vm0, %v367_v23  ;;  %793 = vmatmul.msk.f32.vlgmr.msra.gmra.mxu3 %vm336_vm0, %v374_v24 }
  0x9f   : > { %v431_v8 = vpop.permute.xlu0 %430 }
  0xa1   : > { %v426_v13 = vpop.permute.xlu1 %425 }
  0xa4   : > { %781 = vmatmul.msk.f32.gmra.mxu0 %vm336_vm0, %v362_v27 }
  0xa5   : > { %787 = vmatmul.msk.f32.gmra.mxu1 %vm336_vm0, %v368_v28  ;;  %794 = vmatmul.msk.f32.gmra.mxu3 %vm336_vm0, %v375_v29 }
  0xa7   : > { %v416_v21 = vpop.permute.xlu0 %415 }
  0xa9   : > { %v411_v24 = vpop.permute.xlu1 %410 }
  0xac   : > { %782 = vmatmul.msk.f32.gmra.mxu0 %vm336_vm0, %v363_v32 }
  0xad   : > { %788 = vmatmul.msk.f32.gmra.mxu1 %vm336_vm0, %v369_v33  ;;  %795 = vmatmul.msk.f32.gmra.mxu3 %vm336_vm0, %v376_v34  ;;  %v406_v34 = vpop.permute.xlu2 %405 }
  0xb1   : > { %v396_v38 = vpop.permute.xlu1 %395 }
  0xb4   : > { %783 = vmatmul.msk.f32.gmra.mxu0 %vm336_vm0, %v364_v36 }
  0xb5   : > { %789 = vmatmul.msk.f32.gmra.mxu1 %vm336_vm0, %v370_v37  ;;  %v401_v37 = vpop.permute.xlu0 %400 }
  0xbc   : > { %784 = vmatmul.msk.f32.gmra.mxu0 %vm336_vm0, %v365_v39 }
  0xbd   : > { %790 = vmatmul.msk.f32.gmra.mxu1 %vm336_vm0, %v371_v40 }
  0xc4   : > { %785 = vmatmul.msk.f32.gmra.mxu0 %vm336_vm0, %v366_v42 }
  0xc5   : > { %791 = vmatmul.msk.f32.gmra.mxu1 %vm336_vm0, %v372_v43 }
  0xcd   : > { %792 = vmatmul.msk.f32.gmra.mxu1 %vm336_vm0, %v373_v44 }
 0x119   : > { %v1164_v47 = vpop.f32.mrf.mxu0 }
 0x11a   : > { %v556_v45 = vpop.f32.mrf.mxu1  ;;  %v539_v42 = vadd.f32 %v1164_v47, %v396_v38  ;;  %v603_v47 = vld [vmem:[%s1222_s5 + $0x8] sm:$0xff] }
 0x11b   : > { %v557_v26 = vadd.f32 %v556_v45, %v426_v13  ;;  %v602_v45 = vld [vmem:[%s1222_s5] sm:$0xff] }
 0x11c   : > { %v586_v44 = vmax.f32 %v539_v42, 0.0 }
 0x11d   : > { %v592_v30 = vmax.f32 %v557_v26, 0.0 }
 0x120   : > { %v577_v46 = vpop.f32.mrf.mxu3 }
 0x121   : > { %v1166_v52 = vpop.f32.mrf.mxu0  ;;  %v578_v57 = vadd.f32 %v577_v46, %v461_v55  ;;  %v605_v46 = vld [vmem:[%s1222_s5 + $0x18] sm:$0xff]  ;;  %v623_v55 = vpop.permute.xlu0 %622 }
 0x122   : > { %v559_v48 = vpop.f32.mrf.mxu1  ;;  %v542_v39 = vadd.f32 %v1166_v52, %v401_v37 }
 0x123   : > { %v599_v63 = vmax.f32 %v578_v57, 0.0  ;;  %v560_v22 = vadd.f32 %v559_v48, %v431_v8  ;;  %v604_v48 = vld [vmem:[%s1222_s5 + $0x10] sm:$0xff] }
 0x124   : > { %v587_v43 = vmax.f32 %v542_v39, 0.0 }
 0x125   : > { %v593_v28 = vmax.f32 %v560_v22, 0.0 }
 0x128   : > { %v580_v50 = vpop.f32.mrf.mxu3 }
 0x129   : > { %v581_v54 = vadd.f32 %v580_v50, %v466_v49  ;;  %v544_v0 = vpop.f32.mrf.mxu0  ;;  %v628_v49 = vpop.permute.xlu2 %627 }
 0x12a   : > { %v562_v51 = vpop.f32.mrf.mxu1  ;;  %v545_v35 = vadd.f32 %v544_v0, %v406_v34 }
 0x12b   : > { %v600_v60 = vmax.f32 %v581_v54, 0.0  ;;  %v563_v18 = vadd.f32 %v562_v51, %v436_v7 }
 0x12c   : > { %v588_v41 = vmax.f32 %v545_v35, 0.0 }
 0x12d   : > { %v594_v27 = vmax.f32 %v563_v18, 0.0 }
 0x130   : > { %v583_v56 = vpop.f32.mrf.mxu3 }
 0x131   : > { %v584_v58 = vadd.f32 %v583_v56, %v471_v53  ;;  %v547_v4 = vpop.f32.mrf.mxu0  ;;  %v618_v56 = vpop.permute.xlu1 %617 }
 0x132   : > { %v565_v59 = vpop.f32.mrf.mxu1  ;;  %v548_v32 = vadd.f32 %v547_v4, %v411_v24 }
 0x133   : > { %v601_v61 = vmax.f32 %v584_v58, 0.0  ;;  %v566_v16 = vadd.f32 %v565_v59, %v441_v5 }
 0x134   : > { %v589_v40 = vmax.f32 %v548_v32, 0.0 }
 0x135   : > { %630 = vmatpush.msra.mxu2 %v601_v61  ;;  %803 = vmatpush.msrb.mxu3 %v601_v61  ;;  %v595_v23 = vmax.f32 %v566_v16, 0.0 }
 0x137   : > { %631 = vmatpush.msra.mxu2 %v600_v60  ;;  %804 = vmatpush.msrb.mxu3 %v600_v60  ;;  %v613_v60 = vpop.permute.xlu2 %612 }
 0x139   : > { %632 = vmatpush.msra.mxu2 %v599_v63  ;;  %805 = vmatpush.msrb.mxu3 %v599_v63  ;;  %v550_v9 = vpop.f32.mrf.mxu0 }
 0x13a   : > { %v568_v1 = vpop.f32.mrf.mxu1  ;;  %v551_v31 = vadd.f32 %v550_v9, %v416_v21 }
 0x13b   : > { %v569_v14 = vadd.f32 %v568_v1, %v446_v3  ;;  %v663_v1 = vld [vmem:[%s1224_s7] sm:$0xff] }
 0x13c   : > { %v590_v36 = vmax.f32 %v551_v31, 0.0 }
 0x13d   : > { %v596_v19 = vmax.f32 %v569_v14, 0.0 }
 0x141   : > { %v553_v25 = vpop.f32.mrf.mxu0 }
 0x142   : > { %v571_v6 = vpop.f32.mrf.mxu1  ;;  %v554_v29 = vadd.f32 %v553_v25, %v421_v20 }
 0x143   : > { %v572_v11 = vadd.f32 %v571_v6, %v451_v2  ;;  %v668_v2 = vpop.permute.xlu0 %667 }
 0x144   : > { %v591_v33 = vmax.f32 %v554_v29, 0.0 }
 0x145   : > { %v597_v17 = vmax.f32 %v572_v11, 0.0 }
 0x14a   : > { %v574_v10 = vpop.f32.mrf.mxu1 }
 0x14b   : > { %v575_v12 = vadd.f32 %v574_v10, %v456_v62 }
 0x14d   : > { %v598_v15 = vmax.f32 %v575_v12, 0.0 }
 0x14f   : > { %633 = vmatpush.msra.mxu2 %v598_v15  ;;  %806 = vmatpush.msrb.mxu3 %v598_v15 }
 0x151   : > { %634 = vmatpush.msra.mxu2 %v597_v17  ;;  %807 = vmatpush.msrb.mxu3 %v597_v17 }
 0x153   : > { %635 = vmatpush.msra.mxu2 %v596_v19  ;;  %808 = vmatpush.msrb.mxu3 %v596_v19 }
 0x155   : > { %636 = vmatpush.msra.mxu2 %v595_v23  ;;  %809 = vmatpush.msrb.mxu3 %v595_v23 }
 0x157   : > { %637 = vmatpush.msra.mxu2 %v594_v27  ;;  %810 = vmatpush.msrb.mxu3 %v594_v27 }
 0x159   : > { %638 = vmatpush.msra.mxu2 %v593_v28  ;;  %811 = vmatpush.msrb.mxu3 %v593_v28 }
 0x15b   : > { %639 = vmatpush.msra.mxu2 %v592_v30  ;;  %812 = vmatpush.msrb.mxu3 %v592_v30 }
 0x15d   : > { %640 = vmatpush.msra.mxu2 %v591_v33  ;;  %813 = vmatpush.msrb.mxu3 %v591_v33 }
 0x15f   : > { %641 = vmatpush.msra.mxu2 %v590_v36  ;;  %814 = vmatpush.msrb.mxu3 %v590_v36 }
 0x161   : > { %642 = vmatpush.msra.mxu2 %v589_v40  ;;  %815 = vmatpush.msrb.mxu3 %v589_v40 }
 0x163   : > { %643 = vmatpush.msra.mxu2 %v588_v41  ;;  %816 = vmatpush.msrb.mxu3 %v588_v41 }
 0x165   : > { %644 = vmatpush.msra.mxu2 %v587_v43  ;;  %817 = vmatpush.msrb.mxu3 %v587_v43 }
 0x167   : > { %645 = vmatpush.msra.mxu2 %v586_v44  ;;  %818 = vmatpush.msrb.mxu3 %v586_v44 }
 0x168   : > { %646 = vmatmul.f32.vlgmr.msra.gmra.mxu2 %v602_v45  ;;  %655 = vmatmul.f32.vlgmr.msrb.gmra.mxu3 %v605_v46 }
 0x170   : > { %649 = vmatmul.f32.gmra.mxu2 %v603_v47 }
 0x178   : > { %652 = vmatmul.f32.gmra.mxu2 %v604_v48 }
 0x1eb   : > { %v647_v50 = vpop.f32.mrf.mxu2  ;;  %v656_v51 = vpop.f32.mrf.mxu3 }
 0x1ec   : > { %v657_v52 = vadd.f32 %v656_v51, %v628_v49  ;;  %v648_v61 = vadd.f32 %v647_v50, %v613_v60 }
 0x1ee   : > { %v662_v53 = vmax.f32 %v657_v52, 0.0  ;;  %v659_v0 = vmax.f32 %v648_v61, 0.0 }
 0x1f0   : > { %686 = vmatpush.msra.mxu3 %v662_v53 }
 0x1f3   : > { %v650_v54 = vpop.f32.mrf.mxu2 }
 0x1f4   : > { %v651_v58 = vadd.f32 %v650_v54, %v618_v56 }
 0x1f6   : > { %v660_v63 = vmax.f32 %v651_v58, 0.0 }
 0x1fb   : > { %v653_v57 = vpop.f32.mrf.mxu2 }
 0x1fc   : > { %v654_v59 = vadd.f32 %v653_v57, %v623_v55 }
 0x1fe   : > { %v661_v62 = vmax.f32 %v654_v59, 0.0 }
 0x200   : > { %687 = vmatpush.msra.mxu3 %v661_v62 }
 0x202   : > { %688 = vmatpush.msra.mxu3 %v660_v63 }
 0x204   : > { %689 = vmatpush.msra.mxu3 %v659_v0 }
 0x205   : > { %796 = vmatmul.msk.f32.vlgmr.msra.gmra.mxu3 %vm670_vm1, %v663_v1 }
 0x288   : > { %v691_v3 = vpop.f32.mrf.mxu3 }
 0x289   : > { %v692_v4 = vadd.f32 %v691_v3, %v668_v2 }
 0x28b   : > { %vm694_vm2 = vcmp.gt.f32.partialorder %v692_v4, 0.0  ;;  %v695_v5 = vmul.f32 0.01, %v692_v4 }
 0x28d   : > { %v696_v6 = vsel %vm694_vm2, %v692_v4, %v695_v5 }
 0x28e   : > { %697 = vst [vmem:[%s323_s24] sm:$0xff] %v696_v6 }
 0x28f   : > { %889 = shalt.err (!%p886_p3)
}
 0x290   : > { %819 = dma.vmem_to_hbm [thread:$0]  (%p1015_p5), %s712_s25, 128, %s714_s26, %s699_s27  }
 0x291 PF: > { %p825_p4 = scmp.ge.s32.totalorder %s924_s12, 2  ;;  %s725_s14 = sand.u32 1, %s912_s30  }
 0x292   : > { %s726_s23 = scalar_lea.sflag [#allocation3], %s725_s14 }
 0x293   : > { %p822_p7 = pnand %p825_p4, %p1019_p6 }
 0x295   : > { %p823_p8 = pneg %p822_p7 }
 0x297   : > { %907 = dma.done.wait (%p823_p8), %s726_s23, 128  }
 0x298   : > { %909 = vsyncadd (%p823_p8), %s726_s23, 4294967168  ;;  %p19_p9 = scmp.ge.s32.totalorder %s1002_s15, 6   ;;  %s1229_s30 = smov %s916_s10 }
 0x299   : > { %s1230_s10 = smov %s920_s11  ;;  %s1231_s11 = smov %s1013_s18 }
 0x29a   : > { %s1232_s12 = smov %s1002_s15  ;;  %21 = sbr.rel (!%p19_p9) target bundleno = 3 (0x3), region = 91 }
 0x29f   :  { %732 = vsyncpa [#allocation3], 1 }
 0x2a0   :  { %734 = vsyncpa [#allocation3 + $0x1], 1 }

</bundles_post_ra>
